<compile_context>
chip_gen: v6e
topology: v6e:2x2x1
jax: 0.10.0
libtpu: 0.0.40
codegen_flags: <defaults>
</compile_context>

<pallas_src>
import math

import jax
import jax.numpy as jnp
from jax import lax
from jax.experimental import pallas as pl
from jax.experimental.pallas import tpu as pltpu

BASE_HIDDEN_NODES = 4
ENCODING_HIDDEN_NODES = 3
NUM_INPUT_FEATURES = 4
OUT_FEATURES = 6

# rhs-transposed matmul dimension numbers (contract last dim of both operands).
_TRANS_B_DIMS = (((1,), (1,)), ((), ()))


def init_predictor_params(width: int, key):
    """PyTorch-layout params: W is (out_features, in_features), b is (out_features,).

    Init mirrors torch.nn.Linear default (uniform +/- 1/sqrt(fan_in))."""
    h1 = 2 * BASE_HIDDEN_NODES * width
    h2 = BASE_HIDDEN_NODES * width
    dims = [
        (NUM_INPUT_FEATURES, h1),
        (h1, h2),
        (h2, ENCODING_HIDDEN_NODES),
        (ENCODING_HIDDEN_NODES, h2),
        (h2, h1),
        (h1, OUT_FEATURES),
    ]
    params = []
    for fan_in, fan_out in dims:
        key, kw, kb = jax.random.split(key, 3)
        bound = 1.0 / math.sqrt(fan_in)
        w = jax.random.uniform(kw, (fan_out, fan_in), jnp.float32, -bound, bound)
        b = jax.random.uniform(kb, (fan_out,), jnp.float32, -bound, bound)
        params.append((w, b))
    return params


def _augment(w, b, keep_ones_row=True):
    """[[W, b], [0, 1]] so that W_aug @ [h; 1] = [W h + b; 1] (ones row kept)."""
    out_f, in_f = w.shape
    top = jnp.concatenate([w, b.reshape(out_f, 1)], axis=1)            # (out, in+1)
    if not keep_ones_row:
        return top
    bottom = jnp.concatenate(
        [jnp.zeros((1, in_f), w.dtype), jnp.ones((1, 1), w.dtype)], axis=1)
    return jnp.concatenate([top, bottom], axis=0)                       # (out+1, in+1)


def prepare_kernel_params(params):
    """Fuse the latent linear-linear pair and fold biases into augmented weights.

    Call once; the result is what predictor_forward consumes."""
    (w1, b1), (w2, b2), (w3, b3), (w4, b4), (w5, b5), (w6, b6) = params
    h1 = w1.shape[0]

    # Fuse encoder-out / decoder-in (no ReLU on the latent -> exact).
    w34 = w4 @ w3                     # (h2, h2)
    b34 = w4 @ b3 + b4                # (h2,)

    # Layer 1: x has no ones column, so keep its bias as a tiny column vector.
    # The extra zero weight row + bias value 1 creates the carried ones row.
    w1a = jnp.concatenate([w1, jnp.zeros((1, NUM_INPUT_FEATURES), w1.dtype)], axis=0)
    b1a = jnp.concatenate([b1, jnp.ones((1,), b1.dtype)]).reshape(h1 + 1, 1)

    w2a = _augment(w2, b2)                       # (h2+1, h1+1)
    w34a = _augment(w34, b34)                    # (h2+1, h2+1)
    w5a = _augment(w5, b5)                       # (h1+1, h2+1)
    w6a = _augment(w6, b6, keep_ones_row=False)  # (6,    h1+1)
    return (w1a, b1a, w2a, w34a, w5a, w6a)


def _make_kernel(chunk: int, nchunks: int):
    def kernel(x_ref, w1a_ref, b1a_ref, w2a_ref, w34a_ref, w5a_ref, w6a_ref, o_ref):
        @pl.loop(0, nchunks)
        def _(c):
            off = pl.multiple_of(c * chunk, chunk)

            # (chunk, 4) natural-layout slice of the input tile.
            xc = x_ref[pl.ds(off, chunk), :]

            # Layer 1: layout change happens inside the GEMM (rhs-transposed).
            # (h1+1, 4) x (chunk, 4)^T -> (h1+1, chunk), batch on lanes.
            h = lax.dot_general(w1a_ref[...], xc, _TRANS_B_DIMS,
                                preferred_element_type=jnp.float32)
            h = jnp.maximum(h + b1a_ref[...], 0.0)          # ones row := relu(1) = 1

            # Remaining layers: plain feature-major GEMMs, biases folded in.
            h = jnp.maximum(jnp.dot(w2a_ref[...], h,
                                    preferred_element_type=jnp.float32), 0.0)
            h = jnp.maximum(jnp.dot(w34a_ref[...], h,
                                    preferred_element_type=jnp.float32), 0.0)
            h = jnp.maximum(jnp.dot(w5a_ref[...], h,
                                    preferred_element_type=jnp.float32), 0.0)
            y = jnp.dot(w6a_ref[...], h, preferred_element_type=jnp.float32)

            # Lane-dense (6, chunk) store at a lane offset that is a multiple of 128.
            o_ref[:, pl.ds(off, chunk)] = y

    return kernel


def _pick_batch_tile(batch: int, tb_max: int, chunk: int) -> int:
    """Batch tile: multiple of `chunk`, as large as tb_max, but keep >=2 grid
    steps when there is enough work (v7x megacore sharding of the batch axis)."""
    tb_max = max(chunk, (tb_max // chunk) * chunk)
    n_chunks_total = int(pl.cdiv(batch, chunk))
    if n_chunks_total >= 2:
        tb = min(tb_max, int(pl.cdiv(n_chunks_total, 2)) * chunk)
    else:
        tb = chunk
    return int(tb)


def predictor_forward(x, kparams, *, tb_max: int = 8192, chunk: int = 256,
                      feature_major_output: bool = False):
    """x: (batch, 4) -> (batch, 6)   (or (6, batch) if feature_major_output).

    kparams: output of prepare_kernel_params(params)."""
    batch = int(x.shape[0])
    w1a, b1a, w2a, w34a, w5a, w6a = kparams
    weights = (w1a, b1a, w2a, w34a, w5a, w6a)

    tb = _pick_batch_tile(batch, tb_max, chunk)
    grid = int(pl.cdiv(batch, tb))          # ragged last block, no jnp.pad pass
    nchunks = tb // chunk

    x = x.astype(jnp.float32)

    weight_specs = [pl.BlockSpec(w.shape, lambda i: (0, 0)) for w in weights]

    out_fm = pl.pallas_call(
        _make_kernel(chunk, nchunks),
        out_shape=jax.ShapeDtypeStruct((OUT_FEATURES, batch), jnp.float32),
        grid=(grid,),
        in_specs=[pl.BlockSpec((tb, NUM_INPUT_FEATURES), lambda i: (i, 0))]
                 + weight_specs,
        out_specs=pl.BlockSpec((OUT_FEATURES, tb), lambda i: (0, i)),
        compiler_params=pltpu.CompilerParams(
            dimension_semantics=("parallel",)),
    )(x, *weights)

    if feature_major_output:
        return out_fm                       # (6, batch), no extra HBM pass
    return out_fm.T                         # (batch, 6) to match the module


def predictor_ref(x, params):
    """Pure-JAX reference with the unfused PyTorch-layout params."""
    h = x
    for i, (w, b) in enumerate(params):
        h = h @ w.T + b
        if i not in (2, 5):   # no ReLU after the latent or the final layer
            h = jnp.maximum(h, 0.0)
    return h


if __name__ == "__main__":
    width = 4            # h1 = 32, h2 = 16

    key = jax.random.PRNGKey(0)
    key, kx = jax.random.split(key)
    params = init_predictor_params(width, key)
    kparams = prepare_kernel_params(params)

    # (batch, tb_max): single-tile, multi-tile with ragged edge, multi-tile even grid.
    for batch, tb_max in ((8, 8192), (300, 8192), (2048, 1024)):
        x = jax.random.normal(jax.random.fold_in(kx, batch),
                              (batch, NUM_INPUT_FEATURES), jnp.float32)
        out = jax.block_until_ready(predictor_forward(x, kparams, tb_max=tb_max))
        ref = predictor_ref(x, params)
        assert out.shape == (batch, OUT_FEATURES), out.shape
        assert jnp.allclose(out, ref, atol=3e-5, rtol=3e-5), \
            float(jnp.max(jnp.abs(out - ref)))

    print("KERNEL_OK")
</pallas_src>

<mosaic_0001>
module attributes {stable_mosaic.version = 11 : i64} {
  func.func @kernel(%arg0: i32, %arg1: memref<256x4xf32, #tpu.memory_space<vmem>>, %arg2: memref<33x4xf32, #tpu.memory_space<vmem>>, %arg3: memref<33x1xf32, #tpu.memory_space<vmem>>, %arg4: memref<17x33xf32, #tpu.memory_space<vmem>>, %arg5: memref<17x17xf32, #tpu.memory_space<vmem>>, %arg6: memref<33x17xf32, #tpu.memory_space<vmem>>, %arg7: memref<6x33xf32, #tpu.memory_space<vmem>>, %arg8: memref<6x256xf32, #tpu.memory_space<vmem>>) attributes {dimension_semantics = [#tpu.dimension_semantics<parallel>], iteration_bounds = array<i64: 1>, scalar_prefetch = 0 : i64, scratch_operands = 0 : i64, tpu.core_type = #tpu.core_type<tc>, window_params = [{transform_indices = @transform_0, window_bounds = array<i64: 256, 4>}, {pipeline_mode = #tpu.pipeline_mode<synchronous>, transform_indices = @transform_1, window_bounds = array<i64: 33, 4>}, {pipeline_mode = #tpu.pipeline_mode<synchronous>, transform_indices = @transform_2, window_bounds = array<i64: 33, 1>}, {pipeline_mode = #tpu.pipeline_mode<synchronous>, transform_indices = @transform_3, window_bounds = array<i64: 17, 33>}, {pipeline_mode = #tpu.pipeline_mode<synchronous>, transform_indices = @transform_4, window_bounds = array<i64: 17, 17>}, {pipeline_mode = #tpu.pipeline_mode<synchronous>, transform_indices = @transform_5, window_bounds = array<i64: 33, 17>}, {pipeline_mode = #tpu.pipeline_mode<synchronous>, transform_indices = @transform_6, window_bounds = array<i64: 6, 33>}, {transform_indices = @transform_7, window_bounds = array<i64: 6, 256>}]} {
    %c0_i32 = arith.constant 0 : i32
    %c1_i32 = arith.constant 1 : i32
    %0 = arith.muli %c0_i32, %c1_i32 : i32
    %c0_i32_0 = arith.constant 0 : i32
    %1 = arith.addi %c0_i32_0, %0 : i32
    %c256_i32 = arith.constant 256 : i32
    %2 = arith.muli %1, %c256_i32 : i32
    %3 = tpu.assume_multiple %2, 256 : i32
    %4 = arith.index_cast %3 : i32 to index
    %c0 = arith.constant 0 : index
    %5 = vector.load %arg1[%4, %c0] : memref<256x4xf32, #tpu.memory_space<vmem>>, vector<256x4xf32>
    %c0_1 = arith.constant 0 : index
    %c0_2 = arith.constant 0 : index
    %6 = vector.load %arg2[%c0_1, %c0_2] : memref<33x4xf32, #tpu.memory_space<vmem>>, vector<33x4xf32>
    %cst = arith.constant dense<0.000000e+00> : vector<33x256xf32>
    %7 = tpu.matmul %6, %5, %cst {dimension_numbers = #tpu.dot_dimension_numbers<[1], [1], [0], [0], [0, 0, 1, 0], [], []>} : vector<33x4xf32>, vector<256x4xf32>, vector<33x256xf32> -> vector<33x256xf32>
    %c0_3 = arith.constant 0 : index
    %c0_4 = arith.constant 0 : index
    %8 = vector.load %arg3[%c0_3, %c0_4] : memref<33x1xf32, #tpu.memory_space<vmem>>, vector<33x1xf32>
    %9 = vector.broadcast %8 : vector<33x1xf32> to vector<33x256xf32>
    %10 = arith.addf %7, %9 : vector<33x256xf32>
    %cst_5 = arith.constant 0.000000e+00 : f32
    %11 = vector.broadcast %cst_5 : f32 to vector<33x256xf32>
    %12 = arith.maximumf %10, %11 : vector<33x256xf32>
    %c0_6 = arith.constant 0 : index
    %c0_7 = arith.constant 0 : index
    %13 = vector.load %arg4[%c0_6, %c0_7] : memref<17x33xf32, #tpu.memory_space<vmem>>, vector<17x33xf32>
    %cst_8 = arith.constant dense<0.000000e+00> : vector<17x256xf32>
    %14 = tpu.matmul %13, %12, %cst_8 {dimension_numbers = #tpu.dot_dimension_numbers<[1], [0], [0], [1], [0, 0, 1, 1], [], []>} : vector<17x33xf32>, vector<33x256xf32>, vector<17x256xf32> -> vector<17x256xf32>
    %cst_9 = arith.constant 0.000000e+00 : f32
    %15 = vector.broadcast %cst_9 : f32 to vector<17x256xf32>
    %16 = arith.maximumf %14, %15 : vector<17x256xf32>
    %c0_10 = arith.constant 0 : index
    %c0_11 = arith.constant 0 : index
    %17 = vector.load %arg5[%c0_10, %c0_11] : memref<17x17xf32, #tpu.memory_space<vmem>>, vector<17x17xf32>
    %cst_12 = arith.constant dense<0.000000e+00> : vector<17x256xf32>
    %18 = tpu.matmul %17, %16, %cst_12 {dimension_numbers = #tpu.dot_dimension_numbers<[1], [0], [0], [1], [0, 0, 1, 1], [], []>} : vector<17x17xf32>, vector<17x256xf32>, vector<17x256xf32> -> vector<17x256xf32>
    %cst_13 = arith.constant 0.000000e+00 : f32
    %19 = vector.broadcast %cst_13 : f32 to vector<17x256xf32>
    %20 = arith.maximumf %18, %19 : vector<17x256xf32>
    %c0_14 = arith.constant 0 : index
    %c0_15 = arith.constant 0 : index
    %21 = vector.load %arg6[%c0_14, %c0_15] : memref<33x17xf32, #tpu.memory_space<vmem>>, vector<33x17xf32>
    %cst_16 = arith.constant dense<0.000000e+00> : vector<33x256xf32>
    %22 = tpu.matmul %21, %20, %cst_16 {dimension_numbers = #tpu.dot_dimension_numbers<[1], [0], [0], [1], [0, 0, 1, 1], [], []>} : vector<33x17xf32>, vector<17x256xf32>, vector<33x256xf32> -> vector<33x256xf32>
    %cst_17 = arith.constant 0.000000e+00 : f32
    %23 = vector.broadcast %cst_17 : f32 to vector<33x256xf32>
    %24 = arith.maximumf %22, %23 : vector<33x256xf32>
    %c0_18 = arith.constant 0 : index
    %c0_19 = arith.constant 0 : index
    %25 = vector.load %arg7[%c0_18, %c0_19] : memref<6x33xf32, #tpu.memory_space<vmem>>, vector<6x33xf32>
    %cst_20 = arith.constant dense<0.000000e+00> : vector<6x256xf32>
    %26 = tpu.matmul %25, %24, %cst_20 {dimension_numbers = #tpu.dot_dimension_numbers<[1], [0], [0], [1], [0, 0, 1, 1], [], []>} : vector<6x33xf32>, vector<33x256xf32>, vector<6x256xf32> -> vector<6x256xf32>
    %c0_21 = arith.constant 0 : index
    %27 = arith.index_cast %3 : i32 to index
    %28 = vector.load %arg8[%c0_21, %27] : memref<6x256xf32, #tpu.memory_space<vmem>>, vector<6x256xf32>
    tpu.vector_store %arg8[%c0_21, %27], %26 {strides = array<i32>} : memref<6x256xf32, #tpu.memory_space<vmem>>, vector<6x256xf32>,
    %c1_i32_22 = arith.constant 1 : i32
    return
  }
  func.func @transform_0(%arg0: i32) -> (i32, i32) {
    %c0_i32 = arith.constant 0 : i32
    %c0_i32_0 = arith.constant 0 : i32
    return %arg0, %c0_i32 : i32, i32
  }
  func.func @transform_1(%arg0: i32) -> (i32, i32) {
    %c0_i32 = arith.constant 0 : i32
    %c0_i32_0 = arith.constant 0 : i32
    %c0_i32_1 = arith.constant 0 : i32
    return %c0_i32, %c0_i32_0 : i32, i32
  }
  func.func @transform_2(%arg0: i32) -> (i32, i32) {
    %c0_i32 = arith.constant 0 : i32
    %c0_i32_0 = arith.constant 0 : i32
    %c0_i32_1 = arith.constant 0 : i32
    return %c0_i32, %c0_i32_0 : i32, i32
  }
  func.func @transform_3(%arg0: i32) -> (i32, i32) {
    %c0_i32 = arith.constant 0 : i32
    %c0_i32_0 = arith.constant 0 : i32
    %c0_i32_1 = arith.constant 0 : i32
    return %c0_i32, %c0_i32_0 : i32, i32
  }
  func.func @transform_4(%arg0: i32) -> (i32, i32) {
    %c0_i32 = arith.constant 0 : i32
    %c0_i32_0 = arith.constant 0 : i32
    %c0_i32_1 = arith.constant 0 : i32
    return %c0_i32, %c0_i32_0 : i32, i32
  }
  func.func @transform_5(%arg0: i32) -> (i32, i32) {
    %c0_i32 = arith.constant 0 : i32
    %c0_i32_0 = arith.constant 0 : i32
    %c0_i32_1 = arith.constant 0 : i32
    return %c0_i32, %c0_i32_0 : i32, i32
  }
  func.func @transform_6(%arg0: i32) -> (i32, i32) {
    %c0_i32 = arith.constant 0 : i32
    %c0_i32_0 = arith.constant 0 : i32
    %c0_i32_1 = arith.constant 0 : i32
    return %c0_i32, %c0_i32_0 : i32, i32
  }
  func.func @transform_7(%arg0: i32) -> (i32, i32) {
    %c0_i32 = arith.constant 0 : i32
    %c0_i32_0 = arith.constant 0 : i32
    return %c0_i32, %arg0 : i32, i32
  }
}

</mosaic_0001>

<bundles_post_ra>
// kernel: tpu_custom_call.1
= control target key start
LH: loop header
LB: loop body
LE: loop exit
PB: predicated region body
PF: predicated region fallthrough
CT: control target
= control target key end

     0   :  { %12 = vsyncpa [#allocation3], 0  ;;  %vm94_vm0 = vcmask 31744   ;;  %v882_v3 = vmov 0   ;;  %v883_v43 = vmov 0.0   ;;  %vm324_vm1 = vcmask 1040384   ;;  %s1164_s0 = inlined_call_operand.vmem [shape: f32[8,4], index: 0, kind: input, shape index: {}]   ;;  %s1165_s1 = inlined_call_operand.vmem [shape: f32[33,4], index: 1, kind: input, shape index: {}]   ;;  %s1166_s2 = inlined_call_operand.vmem [shape: f32[33,1], index: 2, kind: input, shape index: {}]   ;;  %s1167_s3 = inlined_call_operand.vmem [shape: f32[17,33], index: 3, kind: input, shape index: {}]   ;;  %s1168_s4 = inlined_call_operand.vmem [shape: f32[17,17], index: 4, kind: input, shape index: {}]   ;;  %s1169_s5 = inlined_call_operand.vmem [shape: f32[33,17], index: 5, kind: input, shape index: {}]   ;;  %s1170_s6 = inlined_call_operand.vmem [shape: f32[6,33], index: 6, kind: input, shape index: {}]   ;;  %s1171_s7 = inlined_call_operand.hbm [shape: f32[6,8], index: 7, kind: output, shape index: {}]  }
   0x1   :  { %v58_v0 = vld [vmem:[%s1164_s0 + $0xf8] sm:$0xff]  ;;  %v57_v2 = vld [vmem:[%s1164_s0 + $0xf0] sm:$0xff]  ;;  %858 = vset.pattern.permute.xlu0 %v882_v3  ;;  %859 = vset.pattern.permute.xlu1 %v882_v3  ;;  %v56_v5 = vld [vmem:[%s1164_s0 + $0xe8] sm:$0xff]  ;;  %vm314_vm2 = vcmask 269312   ;;  %vm423_vm3 = vcmask 138240  }
   0x2   :  { %v42_v1 = vld [vmem:[%s1164_s0 + $0x78] sm:$0xff]  ;;  %813 = vmatprep.subr.msk.mxu0 %vm94_vm0, %v58_v0  ;;  %v41_v4 = vld [vmem:[%s1164_s0 + $0x70] sm:$0xff]  ;;  %v40_v6 = vld [vmem:[%s1164_s0 + $0x68] sm:$0xff]  ;;  %395 = vmatprep.mubr.f32.mxu1 %v883_v43 }
   0x3   :  { %814 = vmatpush3.xpose.msk.msra.mxu0 %vm94_vm0, %v42_v1  ;;  %v55_v7 = vld [vmem:[%s1164_s0 + $0xe0] sm:$0xff]  ;;  %v54_v10 = vld [vmem:[%s1164_s0 + $0xd8] sm:$0xff]  ;;  %v66_v12 = vld [vmem:[%s1166_s2 + $0x10] sm:$0xff] }
   0x4   :  { %815 = vmatprep.subr.msk.mxu0 %vm94_vm0, %v57_v2  ;;  %v39_v8 = vld [vmem:[%s1164_s0 + $0x60] sm:$0xff]  ;;  %v67_v13 = vld [vmem:[%s1166_s2 + $0x18] sm:$0xff]  ;;  %81 = vperm.xlu1 %859, %v66_v12   ;;  %v65_v15 = vld [vmem:[%s1166_s2 + $0x8] sm:$0xff] }
   0x5   :  { %v59_v9 = vld [vmem:[%s1165_s1] sm:$0xff]  ;;  %v38_v14 = vld [vmem:[%s1164_s0 + $0x58] sm:$0xff]  ;;  %v53_v16 = vld [vmem:[%s1164_s0 + $0xd0] sm:$0xff] }
   0x6   :  { %845 = vmatprep.mubr.msk.f32.mxu0 %vm94_vm0, %v59_v9  ;;  %v68_v11 = vld [vmem:[%s1166_s2 + $0x20] sm:$0x1]  ;;  %v37_v18 = vld [vmem:[%s1164_s0 + $0x50] sm:$0xff]  ;;  %v52_v19 = vld [vmem:[%s1164_s0 + $0xc8] sm:$0xff] }
   0x7   :  { %816 = vmatpush3.xpose.msk.msra.mxu0 %vm94_vm0, %v41_v4  ;;  %91 = vperm.xlu0 %858, %v68_v11   ;;  %v64_v17 = vld [vmem:[%s1166_s2] sm:$0xff]  ;;  %v36_v20 = vld [vmem:[%s1164_s0 + $0x48] sm:$0xff]  ;;  %v50_v23 = vld [vmem:[%s1164_s0 + $0xb8] sm:$0xff] }
   0x8   :  { %817 = vmatprep.subr.msk.mxu0 %vm94_vm0, %v56_v5  ;;  %76 = vperm.xlu1 %859, %v65_v15   ;;  %v51_v21 = vld [vmem:[%s1164_s0 + $0xc0] sm:$0xff]  ;;  %v34_v24 = vld [vmem:[%s1164_s0 + $0x38] sm:$0xff]  ;;  %v49_v25 = vld [vmem:[%s1164_s0 + $0xb0] sm:$0xff] }
   0x9   :  { %v35_v22 = vld [vmem:[%s1164_s0 + $0x40] sm:$0xff]  ;;  %v33_v26 = vld [vmem:[%s1164_s0 + $0x30] sm:$0xff]  ;;  %v48_v27 = vld [vmem:[%s1164_s0 + $0xa8] sm:$0xff] }
   0xa   :  { %v32_v28 = vld [vmem:[%s1164_s0 + $0x28] sm:$0xff]  ;;  %v47_v29 = vld [vmem:[%s1164_s0 + $0xa0] sm:$0xff]  ;;  %v46_v31 = vld [vmem:[%s1164_s0 + $0x98] sm:$0xff] }
   0xb   :  { %818 = vmatpush3.xpose.msk.msra.mxu0 %vm94_vm0, %v40_v6  ;;  %86 = vperm.xlu0 %858, %v67_v13   ;;  %v31_v30 = vld [vmem:[%s1164_s0 + $0x20] sm:$0xff]  ;;  %v30_v32 = vld [vmem:[%s1164_s0 + $0x18] sm:$0xff]  ;;  %v45_v33 = vld [vmem:[%s1164_s0 + $0x90] sm:$0xff] }
   0xc   :  { %819 = vmatprep.subr.msk.mxu0 %vm94_vm0, %v55_v7  ;;  %v29_v34 = vld [vmem:[%s1164_s0 + $0x10] sm:$0xff]  ;;  %v44_v35 = vld [vmem:[%s1164_s0 + $0x88] sm:$0xff]  ;;  %v43_v37 = vld [vmem:[%s1164_s0 + $0x80] sm:$0xff] }
   0xd   :  { %v28_v36 = vld [vmem:[%s1164_s0 + $0x8] sm:$0xff]  ;;  %v27_v38 = vld [vmem:[%s1164_s0] sm:$0xff]  ;;  %v61_v40 = vld [vmem:[%s1165_s1 + $0x10] sm:$0xff] }
   0xe   :  { %v60_v39 = vld [vmem:[%s1165_s1 + $0x8] sm:$0xff]  ;;  %v62_v41 = vld [vmem:[%s1165_s1 + $0x18] sm:$0xff]  ;;  %v63_v42 = vld [vmem:[%s1165_s1 + $0x20] sm:$0x1] }
   0xf   :  { %820 = vmatpush3.xpose.msk.msra.mxu0 %vm94_vm0, %v39_v8  ;;  %71 = vperm.xlu0 %858, %v64_v17   ;;  %v311_v15 = vld [vmem:[%s1167_s3] sm:$0xff]  ;;  %v313_v17 = vld [vmem:[%s1167_s3 + $0x10] sm:$0x1] }
  0x10   :  { %821 = vmatprep.subr.msk.mxu0 %vm94_vm0, %v54_v10 }
  0x13   :  { %822 = vmatpush3.xpose.msk.msra.mxu0 %vm94_vm0, %v38_v14 }
  0x14   :  { %823 = vmatprep.subr.msk.mxu0 %vm94_vm0, %v53_v16  ;;  %v312_v16 = vld [vmem:[%s1167_s3 + $0x8] sm:$0xff] }
  0x17   :  { %824 = vmatpush3.xpose.msk.msra.mxu0 %vm94_vm0, %v37_v18 }
  0x18   :  { %825 = vmatprep.subr.msk.mxu0 %vm94_vm0, %v52_v19 }
  0x1b   :  { %826 = vmatpush3.xpose.msk.msra.mxu0 %vm94_vm0, %v36_v20 }
  0x1c   :  { %827 = vmatprep.subr.msk.mxu0 %vm94_vm0, %v51_v21 }
  0x1f   :  { %828 = vmatpush3.xpose.msk.msra.mxu0 %vm94_vm0, %v35_v22 }
  0x20   :  { %829 = vmatprep.subr.msk.mxu0 %vm94_vm0, %v50_v23 }
  0x23   :  { %830 = vmatpush3.xpose.msk.msra.mxu0 %vm94_vm0, %v34_v24 }
  0x24   :  { %831 = vmatprep.subr.msk.mxu0 %vm94_vm0, %v49_v25 }
  0x27   :  { %832 = vmatpush3.xpose.msk.msra.mxu0 %vm94_vm0, %v33_v26 }
  0x28   :  { %833 = vmatprep.subr.msk.mxu0 %vm94_vm0, %v48_v27 }
  0x2b   :  { %834 = vmatpush3.xpose.msk.msra.mxu0 %vm94_vm0, %v32_v28 }
  0x2c   :  { %835 = vmatprep.subr.msk.mxu0 %vm94_vm0, %v47_v29 }
  0x2f   :  { %836 = vmatpush3.xpose.msk.msra.mxu0 %vm94_vm0, %v31_v30  ;;  %v420_v30 = vld [vmem:[%s1168_s4] sm:$0xff] }
  0x30   :  { %837 = vmatprep.subr.msk.mxu0 %vm94_vm0, %v46_v31  ;;  %v421_v31 = vld [vmem:[%s1168_s4 + $0x8] sm:$0xff] }
  0x33   :  { %838 = vmatpush3.xpose.msk.msra.mxu0 %vm94_vm0, %v30_v32  ;;  %v422_v32 = vld [vmem:[%s1168_s4 + $0x10] sm:$0x1] }
  0x34   :  { %839 = vmatprep.subr.msk.mxu0 %vm94_vm0, %v45_v33 }
  0x37   :  { %840 = vmatpush3.xpose.msk.msra.mxu0 %vm94_vm0, %v29_v34 }
  0x38   :  { %841 = vmatprep.subr.msk.mxu0 %vm94_vm0, %v44_v35 }
  0x3b   :  { %842 = vmatpush3.xpose.msk.msra.mxu0 %vm94_vm0, %v28_v36 }
  0x3c   :  { %843 = vmatprep.subr.msk.mxu0 %vm94_vm0, %v43_v37 }
  0x3f   :  { %844 = vmatpush3.xpose.msk.msra.mxu0 %vm94_vm0, %v27_v38 }
  0x42   :  { %846 = vmatmul.mubr.msk.f32.vlgmr.msra.gmra.mxu0 %vm94_vm0, %v59_v9 }
  0x43   :  { %847 = vmatprep.mubr.msk.f32.mxu0 %vm94_vm0, %v60_v39 }
  0x46   :  { %848 = vmatmul.mubr.msk.f32.gmra.mxu0 %vm94_vm0, %v60_v39 }
  0x47   :  { %849 = vmatprep.mubr.msk.f32.mxu0 %vm94_vm0, %v61_v40 }
  0x4a   :  { %850 = vmatmul.mubr.msk.f32.gmra.mxu0 %vm94_vm0, %v61_v40 }
  0x4b   :  { %851 = vmatprep.mubr.msk.f32.mxu0 %vm94_vm0, %v62_v41 }
  0x4e   :  { %852 = vmatmul.mubr.msk.f32.gmra.mxu0 %vm94_vm0, %v62_v41 }
  0x4f   :  { %853 = vmatprep.mubr.msk.f32.mxu0 %vm94_vm0, %v63_v42 }
  0x52   :  { %854 = vmatmul.mubr.msk.f32.gmra.mxu0 %vm94_vm0, %v63_v42 }
  0x7f   :  { %v82_v53 = vpop.permute.xlu1 %81 }
  0x82   :  { %v92_v50 = vpop.permute.xlu0 %91 }
  0x83   :  { %v77_v61 = vpop.permute.xlu1 %76 }
  0x86   :  { %v87_v55 = vpop.permute.xlu0 %86 }
  0x8a   :  { %v72_v2 = vpop.permute.xlu0 %71 }
 0x102   :  { %v272_v44 = vpop.f32.mrf.mxu0 }
 0x103   :  { %v273_v9 = vadd.f32 %v272_v44, %v72_v2 }
 0x104   :  { %v274_v45 = vpop.f32.mrf.mxu0 }
 0x105   :  { %v275_v7 = vadd.f32 %v274_v45, %v72_v2  ;;  %v301_v14 = vmax.f32 %v273_v9, 0.0 }
 0x106   :  { %v278_v46 = vpop.f32.mrf.mxu0 }
 0x107   :  { %v279_v5 = vadd.f32 %v278_v46, %v77_v61  ;;  %v302_v13 = vmax.f32 %v275_v7, 0.0  ;;  %v528_v46 = vld [vmem:[%s1169_s5] sm:$0xff] }
 0x108   :  { %v280_v47 = vpop.f32.mrf.mxu0 }
 0x109   :  { %v281_v3 = vadd.f32 %v280_v47, %v77_v61  ;;  %v303_v12 = vmax.f32 %v279_v5, 0.0  ;;  %v529_v47 = vld [vmem:[%s1169_s5 + $0x8] sm:$0xff] }
 0x10a   :  { %v284_v48 = vpop.f32.mrf.mxu0 }
 0x10b   :  { %v285_v0 = vadd.f32 %v284_v48, %v82_v53  ;;  %v304_v11 = vmax.f32 %v281_v3, 0.0  ;;  %v530_v48 = vld [vmem:[%s1169_s5 + $0x10] sm:$0xff] }
 0x10c   :  { %v286_v49 = vpop.f32.mrf.mxu0 }
 0x10d   :  { %v287_v62 = vadd.f32 %v286_v49, %v82_v53  ;;  %v305_v10 = vmax.f32 %v285_v0, 0.0  ;;  %v531_v49 = vld [vmem:[%s1169_s5 + $0x18] sm:$0xff] }
 0x10e   :  { %v290_v51 = vpop.f32.mrf.mxu0 }
 0x10f   :  { %v291_v60 = vadd.f32 %v290_v51, %v87_v55  ;;  %v306_v8 = vmax.f32 %v287_v62, 0.0 }
 0x110   :  { %v292_v52 = vpop.f32.mrf.mxu0 }
 0x111   :  { %v293_v58 = vadd.f32 %v292_v52, %v87_v55  ;;  %v307_v6 = vmax.f32 %v291_v60, 0.0 }
 0x112   :  { %v296_v54 = vpop.f32.mrf.mxu0 }
 0x113   :  { %v297_v56 = vadd.f32 %v296_v54, %v92_v50  ;;  %v308_v4 = vmax.f32 %v293_v58, 0.0 }
 0x114   :  { %v298_v57 = vpop.f32.mrf.mxu0 }
 0x115   :  { %v299_v59 = vadd.f32 %v298_v57, %v92_v50  ;;  %v309_v1 = vmax.f32 %v297_v56, 0.0  ;;  %v532_v50 = vld [vmem:[%s1169_s5 + $0x20] sm:$0x1] }
 0x117   :  { %v310_v63 = vmax.f32 %v299_v59, 0.0 }
 0x119   :  { %793 = vmatprep.subr.msk.mxu1 %vm324_vm1, %v310_v63 }
 0x11a   :  { %794 = vmatpush1.msk.msra.mxu1 %vm324_vm1, %v309_v1 }
 0x11b   :  { %355 = vmatprep.subr.mxu1 %v308_v4 }
 0x11c   :  { %356 = vmatpush1.msra.mxu1 %v307_v6  ;;  %v659_v6 = vld [vmem:[%s1170_s6] sm:$0x3f] }
 0x11d   :  { %357 = vmatprep.subr.mxu1 %v306_v8 }
 0x11e   :  { %358 = vmatpush1.msra.mxu1 %v305_v10 }
 0x11f   :  { %359 = vmatprep.subr.mxu1 %v304_v11 }
 0x120   :  { %360 = vmatpush1.msra.mxu1 %v303_v12 }
 0x121   :  { %361 = vmatprep.subr.mxu1 %v302_v13 }
 0x122   :  { %362 = vmatpush1.msra.mxu1 %v301_v14 }
 0x123   :  { %795 = vmatmul.mubr.msk.f32.vlgmr.msra.gmra.mxu1 %vm314_vm2, %v311_v15 }
 0x124   :  { %401 = vmatprep.mubr.f32.mxu1 %v883_v43 }
 0x127   :  { %796 = vmatmul.mubr.msk.f32.gmra.mxu1 %vm314_vm2, %v312_v16 }
 0x128   :  { %407 = vmatprep.mubr.f32.mxu1 %v883_v43 }
 0x12b   :  { %797 = vmatmul.mubr.msk.f32.gmra.mxu1 %vm314_vm2, %v313_v17 }
 0x12c   :  { %503 = vmatprep.mubr.f32.mxu1 %v883_v43 }
 0x1e3   :  { %v397_v18 = vpop.f32.mrf.mxu1 }
 0x1e4   :  { %v414_v29 = vmax.f32 %v397_v18, 0.0 }
 0x1e5   :  { %v399_v19 = vpop.f32.mrf.mxu1 }
 0x1e6   :  { %v415_v28 = vmax.f32 %v399_v19, 0.0 }
 0x1e7   :  { %v403_v20 = vpop.f32.mrf.mxu1 }
 0x1e8   :  { %v416_v27 = vmax.f32 %v403_v20, 0.0 }
 0x1e9   :  { %v405_v21 = vpop.f32.mrf.mxu1 }
 0x1ea   :  { %v417_v26 = vmax.f32 %v405_v21, 0.0 }
 0x1eb   :  { %v409_v22 = vpop.f32.mrf.mxu1 }
 0x1ec   :  { %v418_v25 = vmax.f32 %v409_v22, 0.0 }
 0x1ed   :  { %v411_v23 = vpop.f32.mrf.mxu1 }
 0x1ee   :  { %v419_v24 = vmax.f32 %v411_v23, 0.0 }
 0x1f0   :  { %798 = vmatprep.subr.msk.mxu1 %vm324_vm1, %v419_v24 }
 0x1f1   :  { %799 = vmatpush1.msk.msra.mxu1 %vm324_vm1, %v418_v25 }
 0x1f2   :  { %467 = vmatprep.subr.mxu1 %v417_v26 }
 0x1f3   :  { %468 = vmatpush1.msra.mxu1 %v416_v27 }
 0x1f4   :  { %469 = vmatprep.subr.mxu1 %v415_v28 }
 0x1f5   :  { %470 = vmatpush1.msra.mxu1 %v414_v29 }
 0x1f6   :  { %800 = vmatmul.mubr.msk.f32.vlgmr.msra.gmra.mxu1 %vm423_vm3, %v420_v30 }
 0x1f7   :  { %509 = vmatprep.mubr.f32.mxu1 %v883_v43 }
 0x1fa   :  { %801 = vmatmul.mubr.msk.f32.gmra.mxu1 %vm423_vm3, %v421_v31 }
 0x1fb   :  { %515 = vmatprep.mubr.f32.mxu1 %v883_v43 }
 0x1fe   :  { %802 = vmatmul.mubr.msk.f32.gmra.mxu1 %vm423_vm3, %v422_v32 }
 0x1ff   :  { %618 = vmatprep.mubr.f32.mxu1 %v883_v43 }
 0x2b6   :  { %v505_v33 = vpop.f32.mrf.mxu1 }
 0x2b7   :  { %v522_v45 = vmax.f32 %v505_v33, 0.0 }
 0x2b8   :  { %v507_v34 = vpop.f32.mrf.mxu1 }
 0x2b9   :  { %v523_v44 = vmax.f32 %v507_v34, 0.0 }
 0x2ba   :  { %v511_v35 = vpop.f32.mrf.mxu1 }
 0x2bb   :  { %v524_v42 = vmax.f32 %v511_v35, 0.0 }
 0x2bc   :  { %v513_v36 = vpop.f32.mrf.mxu1 }
 0x2bd   :  { %v525_v41 = vmax.f32 %v513_v36, 0.0 }
 0x2be   :  { %v517_v37 = vpop.f32.mrf.mxu1 }
 0x2bf   :  { %v526_v40 = vmax.f32 %v517_v37, 0.0 }
 0x2c0   :  { %v519_v38 = vpop.f32.mrf.mxu1 }
 0x2c1   :  { %v527_v39 = vmax.f32 %v519_v38, 0.0 }
 0x2c3   :  { %803 = vmatprep.subr.msk.mxu1 %vm324_vm1, %v527_v39 }
 0x2c4   :  { %804 = vmatpush1.msk.msra.mxu1 %vm324_vm1, %v526_v40 }
 0x2c5   :  { %582 = vmatprep.subr.mxu1 %v525_v41 }
 0x2c6   :  { %583 = vmatpush1.msra.mxu1 %v524_v42 }
 0x2c7   :  { %584 = vmatprep.subr.mxu1 %v523_v44 }
 0x2c8   :  { %585 = vmatpush1.msra.mxu1 %v522_v45 }
 0x2c9   :  { %805 = vmatmul.mubr.msk.f32.vlgmr.msra.gmra.mxu1 %vm423_vm3, %v528_v46 }
 0x2ca   :  { %624 = vmatprep.mubr.f32.mxu1 %v883_v43 }
 0x2cd   :  { %806 = vmatmul.mubr.msk.f32.gmra.mxu1 %vm423_vm3, %v529_v47 }
 0x2ce   :  { %630 = vmatprep.mubr.f32.mxu1 %v883_v43 }
 0x2d1   :  { %807 = vmatmul.mubr.msk.f32.gmra.mxu1 %vm423_vm3, %v530_v48 }
 0x2d2   :  { %636 = vmatprep.mubr.f32.mxu1 %v883_v43 }
 0x2d5   :  { %808 = vmatmul.mubr.msk.f32.gmra.mxu1 %vm423_vm3, %v531_v49 }
 0x2d6   :  { %642 = vmatprep.mubr.f32.mxu1 %v883_v43 }
 0x2d9   :  { %809 = vmatmul.mubr.msk.f32.gmra.mxu1 %vm423_vm3, %v532_v50 }
 0x2da   :  { %733 = vmatprep.mubr.f32.mxu1 %v883_v43 }
 0x389   :  { %v620_v51 = vpop.f32.mrf.mxu1 }
 0x38a   :  { %v649_v5 = vmax.f32 %v620_v51, 0.0 }
 0x38b   :  { %v622_v52 = vpop.f32.mrf.mxu1 }
 0x38c   :  { %v650_v4 = vmax.f32 %v622_v52, 0.0 }
 0x38d   :  { %v626_v53 = vpop.f32.mrf.mxu1 }
 0x38e   :  { %v651_v3 = vmax.f32 %v626_v53, 0.0 }
 0x38f   :  { %v628_v54 = vpop.f32.mrf.mxu1 }
 0x390   :  { %v652_v2 = vmax.f32 %v628_v54, 0.0 }
 0x391   :  { %v632_v55 = vpop.f32.mrf.mxu1 }
 0x392   :  { %v653_v43 = vmax.f32 %v632_v55, 0.0 }
 0x393   :  { %v634_v56 = vpop.f32.mrf.mxu1 }
 0x394   :  { %v654_v1 = vmax.f32 %v634_v56, 0.0 }
 0x395   :  { %v638_v57 = vpop.f32.mrf.mxu1 }
 0x396   :  { %v655_v0 = vmax.f32 %v638_v57, 0.0 }
 0x397   :  { %v640_v58 = vpop.f32.mrf.mxu1 }
 0x398   :  { %v656_v63 = vmax.f32 %v640_v58, 0.0 }
 0x399   :  { %v644_v59 = vpop.f32.mrf.mxu1 }
 0x39a   :  { %v657_v62 = vmax.f32 %v644_v59, 0.0 }
 0x39b   :  { %v646_v60 = vpop.f32.mrf.mxu1 }
 0x39c   :  { %v658_v61 = vmax.f32 %v646_v60, 0.0 }
 0x39e   :  { %810 = vmatprep.subr.msk.mxu1 %vm324_vm1, %v658_v61 }
 0x39f   :  { %811 = vmatpush1.msk.msra.mxu1 %vm324_vm1, %v657_v62 }
 0x3a0   :  { %693 = vmatprep.subr.mxu1 %v656_v63 }
 0x3a1   :  { %694 = vmatpush1.msra.mxu1 %v655_v0 }
 0x3a2   :  { %695 = vmatprep.subr.mxu1 %v654_v1 }
 0x3a3   :  { %696 = vmatpush1.msra.mxu1 %v653_v43 }
 0x3a4   :  { %697 = vmatprep.subr.mxu1 %v652_v2 }
 0x3a5   :  { %698 = vmatpush1.msra.mxu1 %v651_v3 }
 0x3a6   :  { %699 = vmatprep.subr.mxu1 %v650_v4 }
 0x3a7   :  { %700 = vmatpush1.msra.mxu1 %v649_v5 }
 0x3a8   :  { %812 = vmatmul.mubr.msk.f32.vlgmr.msra.gmra.mxu1 %vm314_vm2, %v659_v6 }
 0x468   :  { %v735_v7 = vpop.f32.mrf.mxu1 }
 0x469   :  { %740 = vst [vmem:[#allocation2] sm:$0x3f] %v735_v7 }
 0x46a   :  { %v737_v8 = vpop.f32.mrf.mxu1 }
 0x46b   :  { %741 = vst [vmem:[#allocation2 + $0x8] sm:$0x3f] %v737_v8 }
 0x46c   :  { %746 = vsyncadd [#allocation3], 128  ;;  %s884_s9 = smov [#allocation2]  }
 0x46d   :  { %s748_s10 = sshll.u32 %s884_s9, 4  ;;  %s749_s10 = int_to_ptr.vmem [resolvable:$true] %s748_s10 }
 0x46e   :  { %s860_s0 = scalar_lea.vmem %s749_s10, 128  ;;  %s864_s11 = scalar_lea.vmem %s749_s10, 256 }
 0x46f   :  { %p861_p0 = scmp.ne.s32.totalorder %s749_s10, %s860_s0  ;;  %p865_p1 = scmp.lt.s32.totalorder %s749_s10, %s749_s10 }
 0x470   :  { %p866_p2 = scmp.lt.s32.totalorder %s864_s11, %s860_s0 }
 0x472   :  { %p867_p3 = por %p866_p2, %p865_p1 }
 0x474   :  { %p868_p4 = pnand %p867_p3, %p861_p0 }
 0x476   :  { %871 = shalt.err (!%p868_p4)
}
 0x477   :  { %751 = dma.vmem_to_hbm [thread:$0]  %s749_s10, 128, %s1171_s7, [#allocation3]  }
 0x478   :  { %880 = dma.done.wait [#allocation3], 256  }
 0x479   :  { %881 = vsyncadd [#allocation3], 4294967040 }
 0x47a   :  { %755 = vsyncpa [#allocation3], 1 }

</bundles_post_ra>
